<compile_context>
chip_gen: v7x
topology: tpu7x:2x2x1
jax: 0.10.0
libtpu: 0.0.40
codegen_flags: <defaults>
</compile_context>

<pallas_src>
import jax
import jax.numpy as jnp
from jax.experimental import pallas as pl
from jax.experimental.pallas import tpu as pltpu

K = 5          # conv kernel size
KK = K * K     # 25 taps
PAD = 2
C_OUT = 16
NUM_G = 4      # the 4 positions inside each 2x2 pool window


def conv_relu_pool_kernel(w_ref, b_ref, cols_ref, out_ref):
    """Fused conv(as matmul) + MaxPool2d(2) + bias + ReLU for one lane slab.

    w_ref:    (16, 25)           bf16 conv weights, taps flattened kh*5+kw
    b_ref:    (16, 1)            f32 conv bias
    cols_ref: (4, 25, TILE_L)    bf16 im2col patches, one (25,TILE_L) per pool group
    out_ref:  (16, TILE_L)       f32 pooled output tile (lane-dense)
    """
    # Per-group matmuls with a running max: live f32 intermediate stays (16,TILE_L).
    m = jnp.dot(w_ref[...], cols_ref[0], preferred_element_type=jnp.float32)
    for g in range(1, NUM_G):
        m = jnp.maximum(
            m, jnp.dot(w_ref[...], cols_ref[g], preferred_element_type=jnp.float32))
    # max_g ReLU(y_g + b) == ReLU(max_g(y_g) + b): bias+ReLU once, on the VPU in f32.
    out_ref[...] = jnp.maximum(m + b_ref[...], 0.0).astype(out_ref.dtype)


def _im2col_pooled_bf16(x_pad, Hp, Wp):
    """Layout glue (plain JAX, fused by XLA into one bf16 write): (4, 25, N*S).

    group g = 2*p + q is the position inside the 2x2 pool window,
    tap t = kh*K + kw, lane = n*S + i*Wp + j (batch-major, row-major grid).
    x_pad must already be bf16 so no f32 intermediate is ever materialized.
    """
    N = x_pad.shape[0]
    S = Hp * Wp
    groups = []
    for p in range(2):
        for q in range(2):
            taps = []
            for kh in range(K):
                for kw in range(K):
                    sl = x_pad[:, p + kh: p + kh + 2 * Hp: 2,
                                  q + kw: q + kw + 2 * Wp: 2]   # (N, Hp, Wp)
                    taps.append(sl.reshape(N * S))
            groups.append(jnp.stack(taps, axis=0))               # (25, N*S)
    return jnp.stack(groups, axis=0)                             # (4, 25, N*S)


def cnn_forward(x, w, b):
    """Equivalent of CNN.forward: conv1 (conv+relu+maxpool) then flatten.

    x: (N, 1, H, W) f32, w: (16, 1, 5, 5), b: (16,)  ->  (N, 16*(H//2)*(W//2))
    """
    N, c_in, H, W = x.shape
    assert c_in == 1, "CNN.conv1 expects a single input channel"
    assert H % 2 == 0 and W % 2 == 0, "MaxPool2d(2) needs even H, W here"
    Hp, Wp = H // 2, W // 2
    S = Hp * Wp
    L = N * S

    # ---- lane-slab tiling ----
    n128 = pl.cdiv(L, 128)                     # 128-lane columns of work
    if n128 >= 2:
        # >= 2 slabs so v7x's two TensorCores both get work; cap slab at 8192
        # lanes so per-step HBM traffic dwarfs the ~0.35us per-step overhead.
        tl_cols = min(64, pl.cdiv(n128, 2))
    else:
        tl_cols = 1
    TILE_L = tl_cols * 128
    num_slabs = pl.cdiv(n128, tl_cols)
    L_pad = num_slabs * TILE_L

    # ---- wrapper-side layout glue (bf16 end-to-end, no transpose pass) ----
    x_pad = jnp.pad(x[:, 0], ((0, 0), (PAD, PAD), (PAD, PAD))).astype(jnp.bfloat16)
    cols = _im2col_pooled_bf16(x_pad, Hp, Wp)                    # (4, 25, L) bf16
    cols = jnp.pad(cols, ((0, 0), (0, 0), (0, L_pad - L)))       # (4, 25, L_pad)
    w2 = w.reshape(C_OUT, KK).astype(jnp.bfloat16)               # (16, 25) bf16
    b2 = b.reshape(C_OUT, 1).astype(jnp.float32)                 # (16, 1)  f32

    out = pl.pallas_call(
        conv_relu_pool_kernel,
        out_shape=jax.ShapeDtypeStruct((C_OUT, L_pad), jnp.float32),
        grid_spec=pltpu.PrefetchScalarGridSpec(
            num_scalar_prefetch=0,
            grid=(num_slabs,),
            in_specs=[
                pl.BlockSpec((C_OUT, KK), lambda l: (0, 0)),
                pl.BlockSpec((C_OUT, 1), lambda l: (0, 0)),
                pl.BlockSpec((NUM_G, KK, TILE_L), lambda l: (0, 0, l)),
            ],
            out_specs=pl.BlockSpec((C_OUT, TILE_L), lambda l: (0, l)),
        ),
        compiler_params=pltpu.CompilerParams(
            dimension_semantics=("parallel",)),
    )(w2, b2, cols)

    # (16, L_pad) -> drop lane padding -> (N, 16*S) in torch's (C,Hp,Wp) order.
    # TODO(synk): if a Linear consumer existed, fold this permutation into its
    # weight instead of transposing activations in HBM.
    return (out[:, :L].reshape(C_OUT, N, S)
                      .transpose(1, 0, 2)
                      .reshape(N, C_OUT * S))


def reference_forward(x, w, b):
    """Independent pure-JAX f32 reference (conv -> relu -> maxpool -> flatten)."""
    y = jax.lax.conv_general_dilated(
        x, w, window_strides=(1, 1), padding=((PAD, PAD), (PAD, PAD)),
        dimension_numbers=("NCHW", "OIHW", "NCHW"))
    y = y + b[None, :, None, None]
    y = jnp.maximum(y, 0.0)
    y = jax.lax.reduce_window(y, -jnp.inf, jax.lax.max,
                              (1, 1, 2, 2), (1, 1, 2, 2), "VALID")
    return y.reshape(x.shape[0], -1)


if __name__ == "__main__":
    # NOTE: forward() only applies self.conv1 + flatten; conv2 and the Linear
    # head are never used, so they are intentionally not implemented.
    key = jax.random.PRNGKey(0)
    kx, kw, kb = jax.random.split(key, 3)

    N, H, W = 2, 28, 28                       # MNIST-like shape implied by the module
    x = jax.random.normal(kx, (N, 1, H, W), dtype=jnp.float32)
    w = jax.random.normal(kw, (C_OUT, 1, K, K), dtype=jnp.float32) * 0.1
    b = jax.random.normal(kb, (C_OUT,), dtype=jnp.float32) * 0.1

    out = jax.block_until_ready(cnn_forward(x, w, b))
    ref = jax.block_until_ready(reference_forward(x, w, b))

    assert out.shape == (N, C_OUT * (H // 2) * (W // 2)), out.shape
    # Tolerance loosened because cols/weights are fed to the MXU in bf16
    # (accumulation is still f32 via preferred_element_type).
    assert jnp.allclose(out, ref, rtol=2e-2, atol=2e-2), \
        float(jnp.max(jnp.abs(out - ref)))
    print("KERNEL_OK")
</pallas_src>

<mosaic_0001>
module attributes {stable_mosaic.version = 11 : i64} {
  func.func @conv_relu_pool_kernel(%arg0: i32, %arg1: memref<16x25xbf16, #tpu.memory_space<vmem>>, %arg2: memref<16x1xf32, #tpu.memory_space<vmem>>, %arg3: memref<4x25x256xbf16, #tpu.memory_space<vmem>>, %arg4: memref<16x256xf32, #tpu.memory_space<vmem>>) attributes {dimension_semantics = [#tpu.dimension_semantics<parallel>], iteration_bounds = array<i64: 2>, scalar_prefetch = 0 : i64, scratch_operands = 0 : i64, tpu.core_type = #tpu.core_type<tc>, window_params = [{pipeline_mode = #tpu.pipeline_mode<synchronous>, transform_indices = @transform_0, window_bounds = array<i64: 16, 25>}, {pipeline_mode = #tpu.pipeline_mode<synchronous>, transform_indices = @transform_1, window_bounds = array<i64: 16, 1>}, {transform_indices = @transform_2, window_bounds = array<i64: 4, 25, 256>}, {transform_indices = @transform_3, window_bounds = array<i64: 16, 256>}]} {
    %c0 = arith.constant 0 : index
    %c0_0 = arith.constant 0 : index
    %0 = vector.load %arg1[%c0, %c0_0] : memref<16x25xbf16, #tpu.memory_space<vmem>>, vector<16x25xbf16>
    %c0_1 = arith.constant 0 : index
    %c0_2 = arith.constant 0 : index
    %c0_3 = arith.constant 0 : index
    %1 = vector.load %arg3[%c0_1, %c0_2, %c0_3] : memref<4x25x256xbf16, #tpu.memory_space<vmem>>, vector<1x25x256xbf16>
    %2 = vector.shape_cast %1 : vector<1x25x256xbf16> to vector<25x256xbf16>
    %cst = arith.constant dense<0.000000e+00> : vector<16x256xf32>
    %3 = tpu.matmul %0, %2, %cst {dimension_numbers = #tpu.dot_dimension_numbers<[1], [0], [0], [1], [0, 0, 1, 1], [], []>} : vector<16x25xbf16>, vector<25x256xbf16>, vector<16x256xf32> -> vector<16x256xf32>
    %c0_4 = arith.constant 0 : index
    %c0_5 = arith.constant 0 : index
    %4 = vector.load %arg1[%c0_4, %c0_5] : memref<16x25xbf16, #tpu.memory_space<vmem>>, vector<16x25xbf16>
    %c1 = arith.constant 1 : index
    %c0_6 = arith.constant 0 : index
    %c0_7 = arith.constant 0 : index
    %5 = vector.load %arg3[%c1, %c0_6, %c0_7] : memref<4x25x256xbf16, #tpu.memory_space<vmem>>, vector<1x25x256xbf16>
    %6 = vector.shape_cast %5 : vector<1x25x256xbf16> to vector<25x256xbf16>
    %cst_8 = arith.constant dense<0.000000e+00> : vector<16x256xf32>
    %7 = tpu.matmul %4, %6, %cst_8 {dimension_numbers = #tpu.dot_dimension_numbers<[1], [0], [0], [1], [0, 0, 1, 1], [], []>} : vector<16x25xbf16>, vector<25x256xbf16>, vector<16x256xf32> -> vector<16x256xf32>
    %8 = arith.maximumf %3, %7 : vector<16x256xf32>
    %c0_9 = arith.constant 0 : index
    %c0_10 = arith.constant 0 : index
    %9 = vector.load %arg1[%c0_9, %c0_10] : memref<16x25xbf16, #tpu.memory_space<vmem>>, vector<16x25xbf16>
    %c2 = arith.constant 2 : index
    %c0_11 = arith.constant 0 : index
    %c0_12 = arith.constant 0 : index
    %10 = vector.load %arg3[%c2, %c0_11, %c0_12] : memref<4x25x256xbf16, #tpu.memory_space<vmem>>, vector<1x25x256xbf16>
    %11 = vector.shape_cast %10 : vector<1x25x256xbf16> to vector<25x256xbf16>
    %cst_13 = arith.constant dense<0.000000e+00> : vector<16x256xf32>
    %12 = tpu.matmul %9, %11, %cst_13 {dimension_numbers = #tpu.dot_dimension_numbers<[1], [0], [0], [1], [0, 0, 1, 1], [], []>} : vector<16x25xbf16>, vector<25x256xbf16>, vector<16x256xf32> -> vector<16x256xf32>
    %13 = arith.maximumf %8, %12 : vector<16x256xf32>
    %c0_14 = arith.constant 0 : index
    %c0_15 = arith.constant 0 : index
    %14 = vector.load %arg1[%c0_14, %c0_15] : memref<16x25xbf16, #tpu.memory_space<vmem>>, vector<16x25xbf16>
    %c3 = arith.constant 3 : index
    %c0_16 = arith.constant 0 : index
    %c0_17 = arith.constant 0 : index
    %15 = vector.load %arg3[%c3, %c0_16, %c0_17] : memref<4x25x256xbf16, #tpu.memory_space<vmem>>, vector<1x25x256xbf16>
    %16 = vector.shape_cast %15 : vector<1x25x256xbf16> to vector<25x256xbf16>
    %cst_18 = arith.constant dense<0.000000e+00> : vector<16x256xf32>
    %17 = tpu.matmul %14, %16, %cst_18 {dimension_numbers = #tpu.dot_dimension_numbers<[1], [0], [0], [1], [0, 0, 1, 1], [], []>} : vector<16x25xbf16>, vector<25x256xbf16>, vector<16x256xf32> -> vector<16x256xf32>
    %18 = arith.maximumf %13, %17 : vector<16x256xf32>
    %c0_19 = arith.constant 0 : index
    %c0_20 = arith.constant 0 : index
    %19 = vector.load %arg2[%c0_19, %c0_20] : memref<16x1xf32, #tpu.memory_space<vmem>>, vector<16x1xf32>
    %20 = vector.broadcast %19 : vector<16x1xf32> to vector<16x256xf32>
    %21 = arith.addf %18, %20 : vector<16x256xf32>
    %cst_21 = arith.constant 0.000000e+00 : f32
    %22 = vector.broadcast %cst_21 : f32 to vector<16x256xf32>
    %23 = arith.maximumf %21, %22 : vector<16x256xf32>
    %c0_22 = arith.constant 0 : index
    %c0_23 = arith.constant 0 : index
    %24 = vector.load %arg4[%c0_22, %c0_23] : memref<16x256xf32, #tpu.memory_space<vmem>>, vector<16x256xf32>
    tpu.vector_store %arg4[%c0_22, %c0_23], %23 {strides = array<i32>} : memref<16x256xf32, #tpu.memory_space<vmem>>, vector<16x256xf32>,
    return
  }
  func.func @transform_0(%arg0: i32) -> (i32, i32) {
    %c0_i32 = arith.constant 0 : i32
    %c0_i32_0 = arith.constant 0 : i32
    %c0_i32_1 = arith.constant 0 : i32
    return %c0_i32, %c0_i32_0 : i32, i32
  }
  func.func @transform_1(%arg0: i32) -> (i32, i32) {
    %c0_i32 = arith.constant 0 : i32
    %c0_i32_0 = arith.constant 0 : i32
    %c0_i32_1 = arith.constant 0 : i32
    return %c0_i32, %c0_i32_0 : i32, i32
  }
  func.func @transform_2(%arg0: i32) -> (i32, i32, i32) {
    %c0_i32 = arith.constant 0 : i32
    %c0_i32_0 = arith.constant 0 : i32
    %c0_i32_1 = arith.constant 0 : i32
    return %c0_i32, %c0_i32_0, %arg0 : i32, i32, i32
  }
  func.func @transform_3(%arg0: i32) -> (i32, i32) {
    %c0_i32 = arith.constant 0 : i32
    %c0_i32_0 = arith.constant 0 : i32
    return %c0_i32, %arg0 : i32, i32
  }
}

</mosaic_0001>

<bundles_post_ra>
// kernel: tpu_custom_call.1
= control target key start
LH: loop header
LB: loop body
LE: loop exit
PB: predicated region body
PF: predicated region fallthrough
CT: control target
= control target key end

     0   :  { %8 = vsyncpa [#allocation4], 0  ;;  %s1057_s0 = inlined_call_operand.vmem [shape: bf16[16,25], index: 0, kind: input, shape index: {}]   ;;  %s1058_s1 = inlined_call_operand.vmem [shape: f32[16,1], index: 1, kind: input, shape index: {}]   ;;  %s1059_s2 = inlined_call_operand.vmem [shape: bf16[4,25,512], index: 2, kind: input, shape index: {}]   ;;  %s1060_s3 = inlined_call_operand.hbm [shape: f32[16,512], index: 3, kind: output, shape index: {}]  }
   0x1   :  { %10 = vsyncpa [#allocation4 + $0x1], 0  ;;  %s896_s12 = smov 0   ;;  %s898_s13 = smov 0  }
   0x2   :  { %s900_s14 = smov 0   ;;  %s902_s15 = smov 0  }
   0x3 LB: > { %s686_s16 = sadd.s32 4294967295, %s868_s15   ;;  %s687_s17 = sadd.s32 4294967294, %s868_s15   ;;  %s868_s15 = sphi %s902_s15, %s1066_s15   ;;  %s864_s14 = sphi %s900_s14, %s1065_s14   ;;  %s860_s13 = sphi %s898_s13, %s1064_s13   ;;  %s856_s12 = sphi %s896_s12, %s1063_s12  }
   0x4   : > { %s919_s18 = sadd.s32 1, %s868_s15   ;;  %s65_s19 = sadd.s32 1, %s864_s14 }
   0x5   : > { %s62_s20 = ssub.s32 %s868_s15, %s919_s18  ;;  %p72_p0 = scmp.ne.s32.totalorder %s864_s14, %s860_s13 }
   0x6   : > { %p63_p1 = scmp.eq.s32.totalorder %s62_s20, 0  ;;  %p73_p2 = scmp.eq.s32.totalorder %s868_s15, 0 }
   0x7   : > { %p102_p3 = scmp.eq.s32.totalorder %s686_s16, 1  ;;  %p107_p4 = scmp.ne.s32.totalorder %s860_s13, %s856_s12 }
   0x8   : > { %s932_s21 = scalar_select %p63_p1, %s864_s14, %s65_s19  }
   0x9   : > { %p74_p5 = por %p73_p2, %p72_p0  ;;  %p934_p6 = por %p102_p3, %p72_p0 }
   0xa   : > { %p108_p7 = scmp.eq.s32.totalorder %s687_s17, 1  ;;  %p689_p9 = scmp.ge.s32.totalorder %s868_s15, 2 }
   0xc   : > { %p938_p8 = por %p108_p7, %p107_p4  ;;  %130 = sbr.rel (%p689_p9) target bundleno = 31 (0x1f), region = 24 }
  0x13   : > { %133 = sbr.rel (!%p74_p5) target bundleno = 31 (0x1f), region = 28  ;;  %s135_s24 = sand.u32 (%p74_p5), 1, %s864_s14  }
  0x14   : > { %s734_s25 = sshll.u32 (%p74_p5), %s868_s15, 3  ;;  %s690_s26 = sshll.u32 (%p74_p5), %s135_s24, 7 }
  0x15   : > { %s950_s29 = scalar_lea.vmem (%p74_p5), %s1059_s2, %s734_s25  ;;  %s137_s30 = scalar_lea.vmem (%p74_p5), [#allocation2], %s690_s26 }
  0x16   : > { %v198_v0 = vld [vmem:[%s950_s29] sm:$0xff] (%p74_p5)  ;;  %v200_v1 = vld [vmem:[%s950_s29 + $0x10] sm:$0xff] (%p74_p5) }
  0x17   : > { %v202_v2 = vld [vmem:[%s950_s29 + $0x20] sm:$0xff] (%p74_p5)  ;;  %199 = vst [vmem:[%s137_s30] sm:$0xff] (%p74_p5), %v198_v0  ;;  %201 = vst [vmem:[%s137_s30 + $0x8] sm:$0xff] (%p74_p5), %v200_v1  ;;  %v204_v3 = vld [vmem:[%s950_s29 + $0x30] sm:$0xff] (%p74_p5) }
  0x18   : > { %203 = vst [vmem:[%s137_s30 + $0x10] sm:$0xff] (%p74_p5), %v202_v2  ;;  %v206_v4 = vld [vmem:[%s950_s29 + $0x40] sm:$0xff] (%p74_p5)  ;;  %v208_v5 = vld [vmem:[%s950_s29 + $0x50] sm:$0xff] (%p74_p5)  ;;  %205 = vst [vmem:[%s137_s30 + $0x18] sm:$0xff] (%p74_p5), %v204_v3 }
  0x19   : > { %207 = vst [vmem:[%s137_s30 + $0x20] sm:$0xff] (%p74_p5), %v206_v4  ;;  %209 = vst [vmem:[%s137_s30 + $0x28] sm:$0xff] (%p74_p5), %v208_v5  ;;  %v210_v6 = vld [vmem:[%s950_s29 + $0x60] sm:$0xff] (%p74_p5)  ;;  %v212_v7 = vld [vmem:[%s950_s29 + $0x70] sm:$0xff] (%p74_p5) }
  0x1a   : > { %v214_v8 = vld [vmem:[%s950_s29 + $0x80] sm:$0xff]  ;;  %211 = vst [vmem:[%s137_s30 + $0x30] sm:$0xff] %v210_v6  ;;  %213 = vst [vmem:[%s137_s30 + $0x38] sm:$0xff] %v212_v7  ;;  %v216_v9 = vld [vmem:[%s950_s29 + $0x90] sm:$0xff] }
  0x1b   : > { %215 = vst [vmem:[%s137_s30 + $0x40] sm:$0xff] %v214_v8  ;;  %v218_v10 = vld [vmem:[%s950_s29 + $0xa0] sm:$0xff]  ;;  %v220_v11 = vld [vmem:[%s950_s29 + $0xb0] sm:$0xff]  ;;  %217 = vst [vmem:[%s137_s30 + $0x48] sm:$0xff] %v216_v9 }
  0x1c   : > { %219 = vst [vmem:[%s137_s30 + $0x50] sm:$0xff] %v218_v10  ;;  %221 = vst [vmem:[%s137_s30 + $0x58] sm:$0xff] %v220_v11  ;;  %v222_v12 = vld [vmem:[%s950_s29 + $0xc0] sm:$0xff]  ;;  %v224_v13 = vld [vmem:[%s950_s29 + $0xd0] sm:$0xff] }
  0x1d   : > { %v226_v14 = vld [vmem:[%s950_s29 + $0xe0] sm:$0xff]  ;;  %223 = vst [vmem:[%s137_s30 + $0x60] sm:$0xff] %v222_v12  ;;  %225 = vst [vmem:[%s137_s30 + $0x68] sm:$0xff] %v224_v13  ;;  %v228_v15 = vld [vmem:[%s950_s29 + $0xf0] sm:$0xff] }
  0x1e   : > { %227 = vst [vmem:[%s137_s30 + $0x70] sm:$0xff] %v226_v14  ;;  %229 = vst [vmem:[%s137_s30 + $0x78] sm:$0xff] %v228_v15 }
  0x1f PF: > { %p693_p10 = scmp.ge.s32.totalorder %s868_s15, 1  ;;  %p234_p11 = scmp.lt.s32.totalorder %s868_s15, 3 }
  0x21   : > { %p235_p12 = pnand %p693_p10, %p234_p11 }
  0x22   : > { %s971_s4 = sand.u32 (!%p235_p12), 1, %s860_s13   ;;  %vm300_vm0 = vcmask (!%p235_p12), 1043456   ;;  %v870_v16 = vmov (!%p235_p12), 0   ;;  %vm301_vm1 = vcmask (!%p235_p12), 1044480   ;;  %v871_v17 = vmov (!%p235_p12), 65535   ;;  %v581_v19 = vld [vmem:[%s1058_s1] sm:$0xff] (!%p235_p12) }
  0x23   : > { %238 = sbr.rel (%p235_p12) target bundleno = 293 (0x125), region = 66  ;;  %s694_s5 = sshll.u32 (!%p235_p12), %s971_s4, 7  ;;  %342 = vmatprep.mubr.bf16.mxu0 (!%p235_p12), %v870_v16  ;;  %414 = vmatprep.mubr.bf16.mxu1 (!%p235_p12), %v870_v16  ;;  %v302_v18 = vsel (!%p235_p12), %vm300_vm0, 4294967295, %v871_v17  ;;  %v582_v21 = vld [vmem:[%s1058_s1 + $0x8] sm:$0xff] (!%p235_p12)  ;;  %v793_v32 = vld [vmem:[%s1057_s0] sm:$0xff] (!%p235_p12)   ;;  %vm296_vm2 = vcmask (!%p235_p12), 203776  }
  0x24   : > { %780 = vset.pattern.permute.xlu0 (!%p235_p12), %v870_v16  ;;  %s977_s8 = scalar_lea.vmem (!%p235_p12), [#allocation2], %s694_s5  ;;  %v303_v25 = vsel (!%p235_p12), %vm301_vm1, %v302_v18, 0  ;;  %s695_s19 = sshll.u32 (!%p235_p12), %s971_s4, 5 }
  0x25   : > { %v781_v20 = vld [vmem:[%s977_s8 + $0x4] ss:$8 sps:$4 sm:$0xff] (!%p235_p12)   ;;  %585 = vperm.xlu0 (!%p235_p12), %780, %v581_v19   ;;  %v785_v23 = vld [vmem:[%s977_s8] ss:$8 sps:$4 sm:$0xff] (!%p235_p12)   ;;  %s263_s20 = scalar_lea.vmem (!%p235_p12), [#allocation3], %s695_s19  ;;  %s735_s25 = sshll.u32 (!%p235_p12), %s686_s16, 8 }
  0x26   : > { %v783_v22 = vld [vmem:[%s977_s8 + $0x24] ss:$8 sps:$4 sm:$0xff] (!%p235_p12)   ;;  %310 = vmatprep.subr.bf16.mxu0 (!%p235_p12), %v781_v20  ;;  %v786_v24 = vld [vmem:[%s977_s8 + $0x20] ss:$8 sps:$4 sm:$0xff] (!%p235_p12)   ;;  %s619_s24 = sshll.u32 (!%p235_p12), %s263_s20, 4  ;;  %s1013_s28 = scalar_lea.hbm (!%p235_p12), %s1060_s3, %s735_s25  ;;  %s1008_s24 = int_to_ptr.vmem [resolvable:$true] %s619_s24 }
  0x27   : > { %382 = vmatprep.subr.bf16.mxu1 (!%p235_p12), %v783_v22  ;;  %v787_v26 = vld [vmem:[%s977_s8 + $0x14] ss:$8 sps:$4 sm:$0x1f] (!%p235_p12)   ;;  %311 = vmatpush1.bf16.msra.mxu0 (!%p235_p12), %v785_v23  ;;  %v791_v29 = vld [vmem:[%s977_s8 + $0x10] ss:$8 sps:$4 sm:$0x1f] (!%p235_p12)  }
  0x28   : > { %383 = vmatpush1.bf16.msra.mxu1 (!%p235_p12), %v786_v24  ;;  %v789_v27 = vld [vmem:[%s977_s8 + $0x34] ss:$8 sps:$4 sm:$0x1f] (!%p235_p12)   ;;  %v308_v28 = vand.u32 (!%p235_p12), %v787_v26, %v303_v25  ;;  %v792_v30 = vld [vmem:[%s977_s8 + $0x30] ss:$8 sps:$4 sm:$0x1f] (!%p235_p12)   ;;  %v305_v34 = vand.u32 (!%p235_p12), %v791_v29, %v303_v25 }
  0x29   : > { %590 = vperm.xlu0 (!%p235_p12), %780, %v582_v21   ;;  %v380_v31 = vand.u32 (!%p235_p12), %v789_v27, %v303_v25  ;;  %v796_v33 = vld [vmem:[%s977_s8 + $0x44] ss:$8 sps:$4 sm:$0xff] (!%p235_p12)   ;;  %v377_v35 = vand.u32 (!%p235_p12), %v792_v30, %v303_v25  ;;  %v794_v36 = vld [vmem:[%s977_s8 + $0x40] ss:$8 sps:$4 sm:$0xff] (!%p235_p12)   ;;  %s606_s16 = scalar_lea.sflag (!%p235_p12), [#allocation4], %s971_s4  ;;  %s806_s29 = scalar_lea.vmem (!%p235_p12), %s1008_s24, 512 }
  0x2a   : > { %312 = vmatprep.subr.bf16.mxu0 %v308_v28  ;;  %v797_v37 = vld [vmem:[%s977_s8 + $0x60] ss:$8 sps:$4 sm:$0xff]   ;;  %v799_v38 = vld [vmem:[%s977_s8 + $0x64] ss:$8 sps:$4 sm:$0xff]   ;;  %p807_p13 = scmp.ne.s32.totalorder %s1008_s24, %s806_s29  ;;  %s872_s30 = smov [#allocation3]  }
  0x2b   : > { %384 = vmatprep.subr.bf16.mxu1 %v380_v31  ;;  %313 = vmatpush1.bf16.msra.mxu0 %v305_v34  ;;  %v800_v39 = vld [vmem:[%s977_s8 + $0x50] ss:$8 sps:$4 sm:$0x1f]   ;;  %v802_v40 = vld [vmem:[%s977_s8 + $0x54] ss:$8 sps:$4 sm:$0x1f]  }
  0x2c   : > { %385 = vmatpush1.bf16.msra.mxu1 %v377_v35  ;;  %458 = vmatprep.subr.bf16.mxu0 %v796_v33  ;;  %v803_v41 = vld [vmem:[%s977_s8 + $0x70] ss:$8 sps:$4 sm:$0x1f]   ;;  %v456_v42 = vand.u32 %v802_v40, %v303_v25  ;;  %v805_v43 = vld [vmem:[%s977_s8 + $0x74] ss:$8 sps:$4 sm:$0x1f]   ;;  %v453_v45 = vand.u32 %v800_v39, %v303_v25  ;;  %p808_p0 = pnand %p807_p13, %p934_p6 }
  0x2d   : > { %534 = vmatprep.subr.bf16.mxu1 %v799_v38  ;;  %v532_v44 = vand.u32 %v805_v43, %v303_v25  ;;  %v529_v46 = vand.u32 %v803_v41, %v303_v25  ;;  %s810_s5 = sshll.u32 %s872_s30, 4  ;;  %s811_s5 = int_to_ptr.vmem [resolvable:$false] %s810_s5 }
  0x2e   : > { %701 = vmatmul.mubr.msk.bf16.vlgmr.msra.gmra.mrb[0].mxu0 %vm296_vm2, %v793_v32  ;;  %p809_p1 = pneg %p808_p0  ;;  %s812_s6 = scalar_lea.vmem %s811_s5, 1024 }
  0x2f   : > { %710 = vmatmul.mubr.msk.bf16.vlgmr.msra.gmra.mrb[0].mxu1 %vm296_vm2, %v793_v32  ;;  %459 = vmatpush1.bf16.msra.mxu0 %v794_v36  ;;  %p813_p2 = scmp.lt.s32.totalorder %s1008_s24, %s811_s5  ;;  %p814_p3 = scmp.lt.s32.totalorder %s812_s6, %s806_s29 }
  0x30   : > { %535 = vmatpush1.bf16.msra.mxu1 %v797_v37  ;;  %460 = vmatprep.subr.bf16.mxu0 %v456_v42 }
  0x31   : > { %490 = vmatprep.mubr.bf16.mxu0 %v870_v16  ;;  %536 = vmatprep.subr.bf16.mxu1 %v532_v44  ;;  %p815_p4 = por %p814_p3, %p813_p2 }
  0x32   : > { %566 = vmatprep.mubr.bf16.mxu1 %v870_v16 }
  0x33   : > { %461 = vmatpush1.bf16.msra.mxu0 %v453_v45  ;;  %p816_p5 = pnand %p815_p4, %p809_p1 }
  0x34   : > { %537 = vmatpush1.bf16.msra.mxu1 %v529_v46 }
  0x36   : > { %719 = vmatmul.mubr.msk.bf16.vlgmr.msra.gmra.mrb[4].mxu0 %vm296_vm2, %v793_v32 }
  0x37   : > { %728 = vmatmul.mubr.msk.bf16.vlgmr.msra.gmra.mrb[4].mxu1 %vm296_vm2, %v793_v32 }
  0xa4   : > { %v586_v59 = vpop.permute.xlu0 %585 }
  0xa8   : > { %v591_v14 = vpop.permute.xlu0 %590 }
 0x101   : > { %v344_v47 = vpop.f32.mrb[0].mxu0 }
 0x102   : > { %v416_v48 = vpop.f32.mrb[0].mxu1  ;;  %v346_v50 = vpop.f32.mrb[1].mxu0 }
 0x103   : > { %v425_v49 = vmax.f32 %v344_v47, %v416_v48  ;;  %v418_v51 = vpop.f32.mrb[1].mxu1  ;;  %v348_v53 = vpop.f32.mrb[2].mxu0 }
 0x104   : > { %v426_v52 = vmax.f32 %v346_v50, %v418_v51  ;;  %v420_v54 = vpop.f32.mrb[2].mxu1  ;;  %v350_v56 = vpop.f32.mrb[3].mxu0 }
 0x105   : > { %v427_v55 = vmax.f32 %v348_v53, %v420_v54  ;;  %v422_v57 = vpop.f32.mrb[3].mxu1 }
 0x106   : > { %v428_v58 = vmax.f32 %v350_v56, %v422_v57 }
 0x109   : > { %v492_v60 = vpop.f32.mrb[4].mxu0 }
 0x10a   : > { %v568_v61 = vpop.f32.mrb[4].mxu1  ;;  %v501_v62 = vmax.f32 %v425_v49, %v492_v60  ;;  %v494_v63 = vpop.f32.mrb[5].mxu0 }
 0x10b   : > { %v570_v0 = vpop.f32.mrb[5].mxu1  ;;  %v502_v1 = vmax.f32 %v426_v52, %v494_v63  ;;  %v496_v2 = vpop.f32.mrb[6].mxu0 }
 0x10c   : > { %v572_v3 = vpop.f32.mrb[6].mxu1  ;;  %v577_v4 = vmax.f32 %v501_v62, %v568_v61  ;;  %v503_v5 = vmax.f32 %v427_v55, %v496_v2  ;;  %v498_v6 = vpop.f32.mrb[7].mxu0 }
 0x10d   : > { %v574_v7 = vpop.f32.mrb[7].mxu1  ;;  %v578_v8 = vmax.f32 %v502_v1, %v570_v0  ;;  %v504_v9 = vmax.f32 %v428_v58, %v498_v6 }
 0x10e   : > { %v593_v10 = vadd.f32 %v586_v59, %v577_v4  ;;  %v579_v11 = vmax.f32 %v503_v5, %v572_v3 }
 0x10f   : > { %v594_v12 = vadd.f32 %v586_v59, %v578_v8  ;;  %v580_v13 = vmax.f32 %v504_v9, %v574_v7 }
 0x110   : > { %v597_v15 = vmax.f32 %v593_v10, 0.0  ;;  %v595_v16 = vadd.f32 %v591_v14, %v579_v11 }
 0x111   : > { %v598_v17 = vmax.f32 %v594_v12, 0.0  ;;  %v596_v18 = vadd.f32 %v591_v14, %v580_v13 }
 0x112   : > { %601 = vst [vmem:[%s263_s20] sm:$0xff] %v597_v15  ;;  %v599_v19 = vmax.f32 %v595_v16, 0.0 }
 0x113   : > { %602 = vst [vmem:[%s263_s20 + $0x8] sm:$0xff] %v598_v17  ;;  %v600_v20 = vmax.f32 %v596_v18, 0.0 }
 0x114   : > { %603 = vst [vmem:[%s263_s20 + $0x10] sm:$0xff] %v599_v19 }
 0x115   : > { %604 = vst [vmem:[%s263_s20 + $0x18] sm:$0xff] %v600_v20 }
 0x116   : > { %819 = shalt.err (!%p816_p5)
}
 0x117   : > { %s820_s7 = scalar_lea.hbm %s1013_s28, 512  ;;  %s824_s10 = scalar_lea.hbm %s1060_s3, 1024 }
 0x118   : > { %p821_p7 = scmp.ne.s32.totalorder %s1013_s28, %s820_s7  ;;  %p825_p12 = scmp.lt.u32.totalorder %s1013_s28, %s1060_s3 }
 0x119   : > { %p826_p13 = scmp.lt.u32.totalorder %s824_s10, %s820_s7  ;;  %p828_p1 = scmp.lt.u32.totalorder %s820_s7, %s1013_s28 }
 0x11a   : > { %p822_p10 = pnand %p821_p7, %p934_p6 }
 0x11b   : > { %p827_p0 = por %p826_p13, %p825_p12 }
 0x11c   : > { %p823_p11 = pneg %p822_p10 }
 0x11d   : > { %p829_p2 = por %p828_p1, %p827_p0 }
 0x11f   : > { %p830_p3 = pnand %p829_p2, %p823_p11 }
 0x121   : > { %833 = shalt.err (!%p830_p3)
}
 0x122   : > { %s873_s19 = smov 256   ;;  %s874_s20 = smov 512  }
 0x123   : > { %s875_s25 = smov 16  }
 0x124   : > { %736 = dma.vmem_to_hbm [thread:$0]  (%p934_p6), %s1008_s24, 512, %s1013_s28, %s606_s16, %s873_s19, %s874_s20, %s875_s25  }
 0x125 PF: > { %s634_s26 = sand.u32 1, %s856_s12   ;;  %p739_p4 = pnand %p689_p9, %p938_p8 }
 0x126   : > { %s635_s27 = scalar_lea.sflag [#allocation4], %s634_s26 }
 0x127   : > { %851 = dma.done.wait (!%p739_p4), %s635_s27, 512  }
 0x128   : > { %853 = vsyncadd (!%p739_p4), %s635_s27, 4294966784  ;;  %p13_p5 = scmp.ge.s32.totalorder %s919_s18, 4   ;;  %s1063_s12 = smov %s860_s13 }
 0x129   : > { %s1064_s13 = smov %s864_s14  ;;  %s1065_s14 = smov %s932_s21 }
 0x12a   : > { %s1066_s15 = smov %s919_s18  ;;  %15 = sbr.rel (!%p13_p5) target bundleno = 3 (0x3), region = 113 }
 0x131   :  { %640 = vsyncpa [#allocation4], 1 }
 0x132   :  { %642 = vsyncpa [#allocation4 + $0x1], 1 }

</bundles_post_ra>
